<compile_context>
chip_gen: v5e
topology: v5e:2x2
jax: 0.10.0
libtpu: 0.0.40
codegen_flags: <defaults>
</compile_context>

<pallas_src>
import jax
import jax.numpy as jnp
import numpy as np
from jax import lax
from jax.experimental import pallas as pl
from jax.experimental.pallas import tpu as pltpu


def _cfg_denoiser_kernel(scal_ref,        # SMEM (2,): [c_in, image_cfg_scale]
                         z_ref,           # (C,  T)  latent tile
                         cond_cc_ref,     # (Cc, T)  cond   c_concat tile
                         uncond_cc_ref,   # (Cc, T)  uncond c_concat tile
                         w_z_ref,         # (C, C)   latent 1x1-conv weights
                         w_c_ref,         # (C, Cc)  concat 1x1-conv weights
                         bias_ref,        # (C, 1)   text-CFG-combined crossattn bias
                         out_ref):        # (C,  T)
    c_in = scal_ref[0]
    i_scale = scal_ref[1]

    # Fold the k-diffusion input scale into the tiny weight tiles (C x C / C x Cc)
    # instead of rescaling every (C, T) activation tile (3x in the old kernel).
    w_z = w_z_ref[...] * c_in
    w_c = w_c_ref[...] * c_in

    # image-CFG mix of the two c_concat branches: single VPU pass over (Cc, T).
    ucc = uncond_cc_ref[...]
    cc_mix = ucc + i_scale * (cond_cc_ref[...] - ucc)

    # One z-matmul + one mixed-cc matmul (f32 accumulation on the MXU).
    h = jnp.dot(w_z, z_ref[...], preferred_element_type=jnp.float32)
    h = h + jnp.dot(w_c, cc_mix, preferred_element_type=jnp.float32)

    # Text-CFG-combined bias column broadcasts over the lane (spatial) axis.
    out_ref[...] = h + bias_ref[...]


def _pick_hw_tile(hw, max_tile=2048):
    """Largest 128-multiple divisor of hw that is <= max_tile (or hw itself)."""
    if hw <= max_tile:
        return hw
    t = max_tile - (max_tile % 128)
    while t >= 128:
        if hw % t == 0:
            return t
        t -= 128
    return hw


def cfg_denoiser_forward(z, sigma, cond, uncond,
                         text_cfg_scale, image_cfg_scale, params):
    """z: (1, C, H, W) f32; sigma: (1,) f32; cond/uncond: dicts like the module."""
    _, C, H, W = z.shape
    HW = H * W
    z2 = z.reshape(C, HW).astype(jnp.float32)

    cond_ca = cond['c_crossattn'][0][0].astype(jnp.float32)      # (T, D)
    uncond_ca = uncond['c_crossattn'][0][0].astype(jnp.float32)  # (T, D)
    cond_cc = cond['c_concat'][0].reshape(-1, HW).astype(jnp.float32)    # (Cc, HW)
    uncond_cc = uncond['c_concat'][0].reshape(-1, HW).astype(jnp.float32)
    Cc = cond_cc.shape[0]

    w1, w_ctx = params                 # w1: (C, C+Cc), w_ctx: (C, D)
    w_z = w1[:, :C].astype(jnp.float32)
    w_c = w1[:, C:].astype(jnp.float32)

    # Tiny cross-attention bias path done host-side of the kernel (D=32 < 128
    # lanes would force masked ops + an XLU reduce inside the kernel for ~0 FLOPs).
    mean_c = jnp.mean(cond_ca, axis=0)                      # (D,)
    mean_u = jnp.mean(uncond_ca, axis=0)                    # (D,)
    ctx_mix = mean_u + jnp.float32(text_cfg_scale) * (mean_c - mean_u)
    bias = (w_ctx.astype(jnp.float32) @ ctx_mix).reshape(C, 1)

    sigma0 = jnp.asarray(sigma, jnp.float32).reshape(-1)[0]
    c_in = lax.rsqrt(sigma0 * sigma0 + jnp.float32(1.0))
    scal = jnp.stack([c_in, jnp.asarray(image_cfg_scale, jnp.float32)])  # (2,)

    tile = _pick_hw_tile(HW)
    grid = (HW // tile,)

    grid_spec = pltpu.PrefetchScalarGridSpec(
        num_scalar_prefetch=1,            # `scal` lands in SMEM
        grid=grid,
        in_specs=[
            pl.BlockSpec((C, tile), lambda j, s: (0, j)),   # z
            pl.BlockSpec((Cc, tile), lambda j, s: (0, j)),  # cond_cc
            pl.BlockSpec((Cc, tile), lambda j, s: (0, j)),  # uncond_cc
            pl.BlockSpec((C, C), lambda j, s: (0, 0)),      # w_z (resident)
            pl.BlockSpec((C, Cc), lambda j, s: (0, 0)),     # w_c (resident)
            pl.BlockSpec((C, 1), lambda j, s: (0, 0)),      # bias column
        ],
        out_specs=pl.BlockSpec((C, tile), lambda j, s: (0, j)),
    )

    flops = 2 * C * (C + Cc) * HW + 3 * Cc * HW + 2 * C * HW
    bytes_accessed = 4 * ((C + 2 * Cc + C) * HW + C * (C + Cc) + C + 2)
    cost = pl.CostEstimate(flops=flops, transcendentals=0,
                           bytes_accessed=bytes_accessed)

    out = pl.pallas_call(
        _cfg_denoiser_kernel,
        out_shape=jax.ShapeDtypeStruct((C, HW), jnp.float32),
        grid_spec=grid_spec,
        compiler_params=pltpu.CompilerParams(
            dimension_semantics=("parallel",)),   # spatial tiles are independent
        cost_estimate=cost,
    )(scal, z2, cond_cc, uncond_cc, w_z, w_c, bias)

    return out.reshape(1, C, H, W)


def _reference(z, sigma, cond, uncond, t_scale, i_scale, params):
    """Pure-JAX reference with the original three-branch CFG structure."""
    w1, w_ctx = params
    _, C, H, W = z.shape
    HW = H * W
    z2 = z.reshape(C, HW)
    c_in = 1.0 / jnp.sqrt(sigma[0] ** 2 + 1.0)

    def inner(ca, cc):
        x = jnp.concatenate([z2, cc.reshape(-1, HW)], axis=0)
        h = (w1 @ x) * c_in
        b = w_ctx @ jnp.mean(ca, axis=0)
        return h + b[:, None]

    oc = inner(cond['c_crossattn'][0][0], cond['c_concat'][0])      # cond
    oi = inner(uncond['c_crossattn'][0][0], cond['c_concat'][0])    # img-cond
    ou = inner(uncond['c_crossattn'][0][0], uncond['c_concat'][0])  # uncond
    return (ou + t_scale * (oc - oi) + i_scale * (oi - ou)).reshape(1, C, H, W)


if __name__ == "__main__":
    C, Cc, H, W, T, D = 4, 4, 16, 16, 8, 32
    key = jax.random.PRNGKey(0)
    keys = jax.random.split(key, 8)

    z = jax.random.normal(keys[0], (1, C, H, W), jnp.float32)
    sigma = jnp.asarray([1.5], jnp.float32)
    cond = {
        'c_crossattn': [jax.random.normal(keys[1], (1, T, D), jnp.float32)],
        'c_concat': [jax.random.normal(keys[2], (1, Cc, H, W), jnp.float32)],
    }
    uncond = {
        'c_crossattn': [jax.random.normal(keys[3], (1, T, D), jnp.float32)],
        'c_concat': [jax.random.normal(keys[4], (1, Cc, H, W), jnp.float32)],
    }
    # deterministic synthetic inner-model weights
    # TODO(synk): the real inner_model is an arbitrary diffusion UNet; here it is a
    # fixed 1x1-conv + crossattn-context-bias stand-in so the CFG path is testable.
    w1 = 0.1 * jax.random.normal(keys[5], (C, C + Cc), jnp.float32)
    w_ctx = 0.1 * jax.random.normal(keys[6], (C, D), jnp.float32)
    params = (w1, w_ctx)

    text_cfg_scale = 7.5
    image_cfg_scale = 1.5

    out = cfg_denoiser_forward(z, sigma, cond, uncond,
                               text_cfg_scale, image_cfg_scale, params)
    out = jax.block_until_ready(out)

    ref = _reference(z, sigma, cond, uncond,
                     text_cfg_scale, image_cfg_scale, params)
    assert out.shape == (1, C, H, W)
    np.testing.assert_allclose(np.asarray(out), np.asarray(ref),
                               rtol=2e-3, atol=2e-3)
    print("KERNEL_OK")
</pallas_src>

<mosaic_0001>
module attributes {stable_mosaic.version = 11 : i64} {
  func.func @_cfg_denoiser_kernel(%arg0: i32, %arg1: memref<2xf32, #tpu.memory_space<smem>>, %arg2: memref<4x256xf32, #tpu.memory_space<vmem>>, %arg3: memref<4x256xf32, #tpu.memory_space<vmem>>, %arg4: memref<4x256xf32, #tpu.memory_space<vmem>>, %arg5: memref<4x4xf32, #tpu.memory_space<vmem>>, %arg6: memref<4x4xf32, #tpu.memory_space<vmem>>, %arg7: memref<4x1xf32, #tpu.memory_space<vmem>>, %arg8: memref<4x256xf32, #tpu.memory_space<vmem>>) attributes {dimension_semantics = [#tpu.dimension_semantics<parallel>], iteration_bounds = array<i64: 1>, scalar_prefetch = 1 : i64, scratch_operands = 0 : i64, tpu.core_type = #tpu.core_type<tc>, window_params = [{transform_indices = @transform_0, window_bounds = array<i64: 4, 256>}, {transform_indices = @transform_1, window_bounds = array<i64: 4, 256>}, {transform_indices = @transform_2, window_bounds = array<i64: 4, 256>}, {pipeline_mode = #tpu.pipeline_mode<synchronous>, transform_indices = @transform_3, window_bounds = array<i64: 4, 4>}, {pipeline_mode = #tpu.pipeline_mode<synchronous>, transform_indices = @transform_4, window_bounds = array<i64: 4, 4>}, {pipeline_mode = #tpu.pipeline_mode<synchronous>, transform_indices = @transform_5, window_bounds = array<i64: 4, 1>}, {transform_indices = @transform_6, window_bounds = array<i64: 4, 256>}]} {
    %c0 = arith.constant 0 : index
    %0 = memref.load %arg1[%c0] : memref<2xf32, #tpu.memory_space<smem>>
    %c1 = arith.constant 1 : index
    %1 = memref.load %arg1[%c1] : memref<2xf32, #tpu.memory_space<smem>>
    %c0_0 = arith.constant 0 : index
    %c0_1 = arith.constant 0 : index
    %2 = vector.load %arg5[%c0_0, %c0_1] : memref<4x4xf32, #tpu.memory_space<vmem>>, vector<4x4xf32>
    %3 = vector.broadcast %0 : f32 to vector<4x4xf32>
    %4 = arith.mulf %2, %3 : vector<4x4xf32>
    %c0_2 = arith.constant 0 : index
    %c0_3 = arith.constant 0 : index
    %5 = vector.load %arg6[%c0_2, %c0_3] : memref<4x4xf32, #tpu.memory_space<vmem>>, vector<4x4xf32>
    %6 = vector.broadcast %0 : f32 to vector<4x4xf32>
    %7 = arith.mulf %5, %6 : vector<4x4xf32>
    %c0_4 = arith.constant 0 : index
    %c0_5 = arith.constant 0 : index
    %8 = vector.load %arg4[%c0_4, %c0_5] : memref<4x256xf32, #tpu.memory_space<vmem>>, vector<4x256xf32>
    %c0_6 = arith.constant 0 : index
    %c0_7 = arith.constant 0 : index
    %9 = vector.load %arg3[%c0_6, %c0_7] : memref<4x256xf32, #tpu.memory_space<vmem>>, vector<4x256xf32>
    %10 = arith.subf %9, %8 : vector<4x256xf32>
    %11 = vector.broadcast %1 : f32 to vector<4x256xf32>
    %12 = arith.mulf %11, %10 : vector<4x256xf32>
    %13 = arith.addf %8, %12 : vector<4x256xf32>
    %c0_8 = arith.constant 0 : index
    %c0_9 = arith.constant 0 : index
    %14 = vector.load %arg2[%c0_8, %c0_9] : memref<4x256xf32, #tpu.memory_space<vmem>>, vector<4x256xf32>
    %cst = arith.constant dense<0.000000e+00> : vector<4x256xf32>
    %15 = tpu.matmul %4, %14, %cst {dimension_numbers = #tpu.dot_dimension_numbers<[1], [0], [0], [1], [0, 0, 1, 1], [], []>} : vector<4x4xf32>, vector<4x256xf32>, vector<4x256xf32> -> vector<4x256xf32>
    %cst_10 = arith.constant dense<0.000000e+00> : vector<4x256xf32>
    %16 = tpu.matmul %7, %13, %cst_10 {dimension_numbers = #tpu.dot_dimension_numbers<[1], [0], [0], [1], [0, 0, 1, 1], [], []>} : vector<4x4xf32>, vector<4x256xf32>, vector<4x256xf32> -> vector<4x256xf32>
    %17 = arith.addf %15, %16 : vector<4x256xf32>
    %c0_11 = arith.constant 0 : index
    %c0_12 = arith.constant 0 : index
    %18 = vector.load %arg7[%c0_11, %c0_12] : memref<4x1xf32, #tpu.memory_space<vmem>>, vector<4x1xf32>
    %19 = vector.broadcast %18 : vector<4x1xf32> to vector<4x256xf32>
    %20 = arith.addf %17, %19 : vector<4x256xf32>
    %c0_13 = arith.constant 0 : index
    %c0_14 = arith.constant 0 : index
    %21 = vector.load %arg8[%c0_13, %c0_14] : memref<4x256xf32, #tpu.memory_space<vmem>>, vector<4x256xf32>
    tpu.vector_store %arg8[%c0_13, %c0_14], %20 {strides = array<i32>} : memref<4x256xf32, #tpu.memory_space<vmem>>, vector<4x256xf32>,
    return
  }
  func.func @transform_0(%arg0: i32, %arg1: memref<2xf32, #tpu.memory_space<smem>>) -> (i32, i32) {
    %c0_i32 = arith.constant 0 : i32
    %c0_i32_0 = arith.constant 0 : i32
    return %c0_i32, %arg0 : i32, i32
  }
  func.func @transform_1(%arg0: i32, %arg1: memref<2xf32, #tpu.memory_space<smem>>) -> (i32, i32) {
    %c0_i32 = arith.constant 0 : i32
    %c0_i32_0 = arith.constant 0 : i32
    return %c0_i32, %arg0 : i32, i32
  }
  func.func @transform_2(%arg0: i32, %arg1: memref<2xf32, #tpu.memory_space<smem>>) -> (i32, i32) {
    %c0_i32 = arith.constant 0 : i32
    %c0_i32_0 = arith.constant 0 : i32
    return %c0_i32, %arg0 : i32, i32
  }
  func.func @transform_3(%arg0: i32, %arg1: memref<2xf32, #tpu.memory_space<smem>>) -> (i32, i32) {
    %c0_i32 = arith.constant 0 : i32
    %c0_i32_0 = arith.constant 0 : i32
    %c0_i32_1 = arith.constant 0 : i32
    return %c0_i32, %c0_i32_0 : i32, i32
  }
  func.func @transform_4(%arg0: i32, %arg1: memref<2xf32, #tpu.memory_space<smem>>) -> (i32, i32) {
    %c0_i32 = arith.constant 0 : i32
    %c0_i32_0 = arith.constant 0 : i32
    %c0_i32_1 = arith.constant 0 : i32
    return %c0_i32, %c0_i32_0 : i32, i32
  }
  func.func @transform_5(%arg0: i32, %arg1: memref<2xf32, #tpu.memory_space<smem>>) -> (i32, i32) {
    %c0_i32 = arith.constant 0 : i32
    %c0_i32_0 = arith.constant 0 : i32
    %c0_i32_1 = arith.constant 0 : i32
    return %c0_i32, %c0_i32_0 : i32, i32
  }
  func.func @transform_6(%arg0: i32, %arg1: memref<2xf32, #tpu.memory_space<smem>>) -> (i32, i32) {
    %c0_i32 = arith.constant 0 : i32
    %c0_i32_0 = arith.constant 0 : i32
    return %c0_i32, %arg0 : i32, i32
  }
}

</mosaic_0001>

<bundles_post_ra>
// kernel: tpu_custom_call.1
= control target key start
LH: loop header
LB: loop body
LE: loop exit
PB: predicated region body
PF: predicated region fallthrough
CT: control target
= control target key end

     0   :  { %s356_s27 = smov [#allocation3]   ;;  %s431_s0 = inlined_call_operand.hbm [shape: f32[2], index: 0, kind: input, shape index: {}]   ;;  %s432_s1 = inlined_call_operand.hbm [shape: f32[4,256], index: 1, kind: input, shape index: {}]   ;;  %s433_s2 = inlined_call_operand.hbm [shape: f32[4,256], index: 2, kind: input, shape index: {}]   ;;  %s434_s3 = inlined_call_operand.hbm [shape: f32[4,256], index: 3, kind: input, shape index: {}]   ;;  %s435_s4 = inlined_call_operand.vmem [shape: f32[4,4], index: 4, kind: input, shape index: {}]   ;;  %s436_s5 = inlined_call_operand.vmem [shape: f32[4,4], index: 5, kind: input, shape index: {}]   ;;  %s437_s6 = inlined_call_operand.vmem [shape: f32[4,1], index: 6, kind: input, shape index: {}]   ;;  %s438_s7 = inlined_call_operand.hbm [shape: f32[4,256], index: 7, kind: output, shape index: {}]  }
   0x1   :  { %s13_s26 = sshll.u32 %s431_s0, 4  ;;  %s14_s26 = int_to_ptr.hbm [resolvable:$true] %s13_s26 }
   0x2   :  { %16 = dma.hbm_to_smem %s14_s26, 16, %s356_s27, [#allocation2] }
   0x3   :  { %348 = dma.done.wait [#allocation2], 16 }
   0x4   :  { %349 = vsyncadd [#allocation2], 4294967280 }
   0x5   :  { %19 = sfence }
   0x6   :  { %20 = vsyncpa [#allocation5], 0 }
   0x7   :  { %21 = vsyncpa [#allocation8], 0  ;;  %s39_s30 = sshll.u32 %s433_s2, 4  ;;  %s40_s30 = int_to_ptr.hbm [resolvable:$true] %s39_s30 }
   0x8   :  { %22 = vsyncpa [#allocation6], 0  ;;  %s357_s8 = smov [#allocation7]   ;;  %s28_s0 = sshll.u32 %s432_s1, 4  ;;  %s29_s0 = int_to_ptr.hbm [resolvable:$true] %s28_s0 }
   0x9   :  { %s41_s9 = sshll.u32 %s357_s8, 4  ;;  %s358_s12 = smov [#allocation4]   ;;  %s42_s9 = int_to_ptr.vmem [resolvable:$true] %s41_s9 }
   0xa   :  { %44 = dma.hbm_to_vmem [thread:$0]  %s40_s30, 128, %s42_s9, [#allocation8]  }
   0xb   :  { %s30_s13 = sshll.u32 %s358_s12, 4  ;;  %s50_s16 = sshll.u32 %s434_s3, 4  ;;  %s31_s13 = int_to_ptr.vmem [resolvable:$true] %s30_s13  ;;  %s51_s16 = int_to_ptr.hbm [resolvable:$true] %s50_s16 }
   0xc   :  { %33 = dma.hbm_to_vmem [thread:$0]  %s29_s0, 128, %s31_s13, [#allocation5]  }
   0xd   :  { %s359_s2 = smov [#allocation9]  }
   0xe   :  { %s52_s17 = sshll.u32 %s359_s2, 4  ;;  %s53_s17 = int_to_ptr.vmem [resolvable:$true] %s52_s17 }
   0xf   :  { %55 = dma.hbm_to_vmem [thread:$0]  %s51_s16, 128, %s53_s17, [#allocation8]  }
  0x10   :  { %350 = dma.done.wait [#allocation5], 128  }
  0x11   :  { %351 = vsyncadd [#allocation5], 4294967168 }
  0x12   :  { %352 = dma.done.wait [#allocation8], 256  }
  0x13   :  { %353 = vsyncadd [#allocation8], 4294967040  ;;  %s224_s1 = sld [smem:[#allocation3 + $0x1]]  ;;  %v360_v0 = vmov 0   ;;  %v81_v1 = vld [vmem:[#allocation9] sm:$0xff]  ;;  %v82_v2 = vld [vmem:[#allocation7] sm:$0xff] }
  0x14   :  { %239 = vset.pattern.permute.xlu0 %v360_v0  ;;  %v83_v4 = vsub.f32 %v82_v2, %v81_v1  ;;  %v192_v5 = vld [vmem:[%s437_s6] sm:$0xf]  ;;  %s74_s19 = sld [smem:[#allocation3]]  ;;  %v87_v10 = vld [vmem:[#allocation4] sm:$0xff]  ;;  %vm96_vm0 = vcmask 1043456   ;;  %vm92_vm1 = vcmask 31744  }
  0x15   :  { %195 = vperm.xlu0 %239, %v192_v5   ;;  %v79_v8 = vld [vmem:[%s436_s5] sm:$0xf]  ;;  %s361_s5 = smov [#allocation10]   ;;  %s213_s25 = sshll.u32 %s438_s7, 4  ;;  %s214_s25 = int_to_ptr.hbm [resolvable:$true] %s213_s25 }
  0x16   :  { %v76_v14 = vld [vmem:[%s435_s4] sm:$0xf]  ;;  %s211_s23 = sshll.u32 %s361_s5, 4  ;;  %s212_s23 = int_to_ptr.vmem [resolvable:$true] %s211_s23 }
  0x19   :  { %v84_v3 = vstv %s224_s1 }
  0x1a   :  { %v85_v6 = vmul.f32 %v84_v3, %v83_v4  ;;  %v77_v9 = vstv %s74_s19 }
  0x1b   :  { %v80_v11 = vmul.f32 %v79_v8, %v77_v9  ;;  %v78_v15 = vmul.f32 %v77_v9, %v76_v14 }
  0x1c   :  { %v86_v7 = vadd.f32 %v85_v6, %v81_v1 }
  0x1e   :  { %89 = vst [vmem:[#allocation1] ss:$2 sm:$0xff] %v86_v7 }
  0x25   :  { %v90_v12 = vld.sshfl [vmem:[#allocation1] sm:$0xff pattern:$0x75316420]  ;;  %v91_v13 = vld.sshfl [vmem:[#allocation1 + $0x8] sm:$0xff pattern:$0x75316420] }
  0x26   :  { %142 = vst [vmem:[#allocation1] ss:$2 sm:$0xff] %v87_v10  ;;  %225 = vmatpush.msk.msra.mxu0 %vm96_vm0, %v90_v12  ;;  %227 = vmatpush.msk.msra.mxu1 %vm96_vm0, %v91_v13 }
  0x27   :  { %226 = vmatmul.msk.f32.vlgmr.msra.gmra.mxu0 %vm92_vm1, %v80_v11  ;;  %228 = vmatmul.msk.f32.vlgmr.msra.gmra.mxu1 %vm92_vm1, %v80_v11 }
  0x2d   :  { %v143_v16 = vld.sshfl [vmem:[#allocation1] sm:$0xff pattern:$0x75316420]  ;;  %v144_v17 = vld.sshfl [vmem:[#allocation1 + $0x8] sm:$0xff pattern:$0x75316420] }
  0x2e   :  { %229 = vmatpush.msk.msra.mxu2 %vm96_vm0, %v143_v16  ;;  %231 = vmatpush.msk.msra.mxu3 %vm96_vm0, %v144_v17 }
  0x2f   :  { %230 = vmatmul.msk.f32.vlgmr.msra.gmra.mxu2 %vm92_vm1, %v78_v15  ;;  %232 = vmatmul.msk.f32.vlgmr.msra.gmra.mxu3 %vm92_vm1, %v78_v15 }
  0x87   :  { %v196_v20 = vpop.permute.xlu0 %195 }
  0xa4   :  { %v118_v18 = vpop.f32.mrf.mxu0  ;;  %v138_v19 = vpop.f32.mrf.mxu1 }
  0xb2   :  { %v169_v21 = vpop.f32.mrf.mxu2  ;;  %v189_v22 = vpop.f32.mrf.mxu3 }
  0xb3   :  { %v170_v23 = vadd.f32 %v169_v21, %v118_v18  ;;  %v190_v24 = vadd.f32 %v189_v22, %v138_v19 }
  0xb5   :  { %v199_v25 = vadd.f32 %v196_v20, %v190_v24  ;;  %v198_v26 = vadd.f32 %v196_v20, %v170_v23 }
  0xb7   :  { %v202_v27 = vrot.slane %v199_v25, 4 }
  0xb9   :  { %v203_v28 = vsel %vm96_vm0, %v198_v26, %v202_v27 }
  0xba   :  { %205 = vst [vmem:[#allocation10] sm:$0xff] %v203_v28 }
  0xbb   :  { %216 = dma.vmem_to_hbm [thread:$0]  %s212_s23, 128, %s214_s25, [#allocation6]  }
  0xbc   :  { %354 = dma.done.wait [#allocation6], 128  }
  0xbd   :  { %355 = vsyncadd [#allocation6], 4294967168 }
  0xbe   :  { %221 = vsyncpa [#allocation5], 1 }
  0xbf   :  { %222 = vsyncpa [#allocation8], 1 }
  0xc0   :  { %223 = vsyncpa [#allocation6], 1 }

</bundles_post_ra>
